<compile_context>
chip_gen: v6e
topology: v6e:2x2x1
jax: 0.10.0
libtpu: 0.0.40
codegen_flags: <defaults>
</compile_context>

<pallas_src>
import functools

import jax
import jax.numpy as jnp
from jax.experimental import pallas as pl
from jax.experimental.pallas import tpu as pltpu


def _ce_label_smooth_kernel(x_ref, t_ref, o_ref, acc_ref, *, epsilon, batch):
    s = pl.program_id(0)              # split index ("parallel" axis)
    i = pl.program_id(1)              # batch-tile index within split ("arbitrary" axis)
    n_i = pl.num_programs(1)

    @pl.when(i == 0)
    def _init():
        acc_ref[...] = jnp.zeros_like(acc_ref)

    x_nat = x_ref[...]                                        # (TB, K) native dtype
    tb, k = x_nat.shape

    # Row-validity mask: handles B % TB != 0 and any clamped duplicate tile (uses the
    # *unclamped* global tile index, consistent with the wrapper's index_map). Garbage
    # rows are only neutralized at the (TB,1) accumulate below; per-row reductions
    # never mix rows and where() does not propagate NaN/Inf from the unselected branch.
    tile = s * n_i + i
    row0 = tile * tb
    rows = row0 + jax.lax.broadcasted_iota(jnp.int32, (tb, 1), 0)
    valid = rows < batch                                      # (TB, 1)

    # ---- log-sum-exp path (f32; exp on the EUP, K-reduction on the MXU) ----
    x = x_nat.astype(jnp.float32)
    m = jnp.max(x, axis=1, keepdims=True)                     # (TB, 1) XLU reduce
    p = jnp.exp(x - m)                                        # (TB, K) EUP
    ones_f32 = jnp.ones((k, 128), jnp.float32)
    sum_exp = jnp.dot(p, ones_f32,
                      preferred_element_type=jnp.float32)[:, 0:1]   # (TB, 1) via MXU
    lse = m + jnp.log(sum_exp)

    # ---- weighted-logit path (native dtype; K-reduction on the MXU) ----
    # Smoothed weights sum to 1, so the max term cancels:
    #   row_loss = lse - sum_k w_k * x_k,  w_k = (1-eps)*[k==t] + eps/K
    c_on = jnp.asarray(1.0 - epsilon + epsilon / k, x_nat.dtype)
    c_off = jnp.asarray(epsilon / k, x_nat.dtype)
    cls = jax.lax.broadcasted_iota(jnp.int32, (tb, k), 1)
    w = jnp.where(cls == t_ref[...], c_on, c_off)             # (TB, K) native dtype
    ones_nat = jnp.ones((k, 128), x_nat.dtype)
    wsum = jnp.dot(w * x_nat, ones_nat,
                   preferred_element_type=jnp.float32)[:, 0:1]      # (TB, 1) via MXU

    row_loss = lse - wsum                                     # (TB, 1) f32
    acc_ref[...] = acc_ref[...] + jnp.where(valid, row_loss, 0.0)

    @pl.when(i == n_i - 1)
    def _finalize():
        partial = jnp.sum(acc_ref[...], keepdims=True)        # (1, 1)
        # Lane-dense full-block store; wrapper reads element [0, 0] of each split block.
        o_ref[...] = jnp.broadcast_to(partial, o_ref.shape).astype(o_ref.dtype)


def cross_entropy_label_smooth(inputs, targets, *, epsilon=0.1, block_rows=None):
    """inputs: (B, K) float logits (f32/bf16); targets: (B,) int class ids. Scalar loss."""
    b, k = inputs.shape
    targets2d = targets.astype(jnp.int32).reshape(b, 1)
    in_itemsize = jnp.dtype(inputs.dtype).itemsize

    # --- hardware queries (with safe fallbacks) ---
    try:
        vmem_cap = int(pltpu.get_tpu_info().vmem_capacity_bytes)
    except Exception:
        vmem_cap = 64 * 1024 * 1024          # conservative (v7x per-TC VMEM)
    try:
        kind = jax.devices()[0].device_kind.lower()
    except Exception:
        kind = ""
    # v7x has 2 TensorCores/chip; v5e/v6e have 1 (a split there only adds overhead).
    num_tc = 2 if "v7" in kind else 1

    # Scoped-VMEM limit: ~3/4 of physical (=> ~48 MiB on v7x, ~96 MiB on v5e/v6e).
    vmem_limit = int(min(vmem_cap * 3 // 4, 100 * 1024 * 1024))

    # --- batch-tile sizing: include the in-kernel (TB, K) temporaries ---
    # per row: double-buffered logits DMA tile + f32 upcast + exp + int32 class iota
    #          + weight & weighted product (native dtype) + slack, plus the lane-padded
    #          target blocks (x2 buffers) and accumulator row.
    bytes_per_row = (k * (2 * in_itemsize      # double-buffered logits tile
                          + 4 + 4 + 4          # x_f32, exp(x-m), class iota
                          + 2 * in_itemsize    # w, w*x (native dtype)
                          + 4)                 # slack for fusion temporaries
                     + 3 * 128 * 4)            # targets (x2) + acc row, lane-padded
    fixed_bytes = 2 * k * 128 * 4 + 2 * 8 * 128 * 4 + (1 << 20)  # ones mats, out, margin

    if block_rows is None:
        tb = (vmem_limit - fixed_bytes) // max(1, bytes_per_row)
    else:
        tb = int(block_rows)
    if b <= tb:
        tb = b                                   # single tile: block == full array dims
    else:
        tb = max(8, min(4096, (tb // 8) * 8))    # multiple of 8 sublanes, generous cap

    num_tiles = pl.cdiv(b, tb)
    nsplit = 2 if (num_tc == 2 and num_tiles >= 2) else 1
    if nsplit == 2 and num_tiles % 2 == 1 and block_rows is None:
        # Prefer an even tile count so no fully-masked duplicate tile is ever DMA'd.
        tb_even = max(8, ((pl.cdiv(b, num_tiles + 1) + 7) // 8) * 8)
        if pl.cdiv(b, tb_even) % 2 == 0:
            tb = tb_even
            num_tiles = pl.cdiv(b, tb)
    tiles_per_split = pl.cdiv(num_tiles, nsplit)

    def block_idx(s, i):
        # Clamp (only reachable if a duplicate tile remains) so the HBM DMA never goes
        # out of bounds; the kernel masks such rows via the unclamped global index.
        return jnp.minimum(s * tiles_per_split + i, num_tiles - 1)

    kernel = functools.partial(_ce_label_smooth_kernel, epsilon=float(epsilon), batch=b)

    out = pl.pallas_call(
        kernel,
        out_shape=jax.ShapeDtypeStruct((nsplit * 8, 128), jnp.float32),
        grid_spec=pltpu.PrefetchScalarGridSpec(
            num_scalar_prefetch=0,
            grid=(nsplit, tiles_per_split),
            in_specs=[
                pl.BlockSpec((tb, k), lambda s, i: (block_idx(s, i), 0)),   # logits
                pl.BlockSpec((tb, 1), lambda s, i: (block_idx(s, i), 0)),   # target ids
            ],
            out_specs=pl.BlockSpec((8, 128), lambda s, i: (s, 0)),          # per-split partial
            scratch_shapes=[pltpu.VMEM((tb, 1), jnp.float32)],              # row-loss accumulator
        ),
        compiler_params=pltpu.CompilerParams(
            # On v7x, pltpu.CORE_PARALLEL on the split axis would force sharding across
            # both TensorCores; kept as "parallel" for portability across chip gens.
            dimension_semantics=("parallel", "arbitrary"),
            vmem_limit_bytes=vmem_limit,
        ),
        cost_estimate=pl.CostEstimate(
            flops=8 * b * k,
            transcendentals=b * (k + 1),
            bytes_accessed=b * k * in_itemsize + b * 4 + nsplit * 8 * 128 * 4,
        ),
    )(inputs, targets2d)

    # Each split's (8,128) block is filled with its partial sum; combine + mean over B.
    return jnp.sum(out[::8, 0]) / b


def _reference(inputs, targets, epsilon=0.1):
    k = inputs.shape[1]
    log_probs = jax.nn.log_softmax(inputs.astype(jnp.float32), axis=1)
    one_hot = jax.nn.one_hot(targets, k, dtype=jnp.float32)
    smoothed = (1.0 - epsilon) * one_hot + epsilon / k
    return jnp.sum(jnp.mean(-smoothed * log_probs, axis=0))


if __name__ == "__main__":
    key = jax.random.PRNGKey(0)
    kx, kt = jax.random.split(key)

    # Case 1: small f32 problem (single tile path).
    batch, num_classes = 8, 16
    x = jax.random.normal(kx, (batch, num_classes), dtype=jnp.float32)
    t = jax.random.randint(kt, (batch,), 0, num_classes, dtype=jnp.int32)
    loss = jax.block_until_ready(cross_entropy_label_smooth(x, t, epsilon=0.1))
    ref = _reference(x, t, epsilon=0.1)
    assert jnp.allclose(loss, ref, atol=1e-4, rtol=1e-4), (loss, ref)

    # Case 2: bf16 logits, B not a multiple of the tile -> exercises the gridded,
    # masked, multi-tile accumulation path (and the bf16 native weighted-sum path).
    kx2, kt2 = jax.random.split(kt)
    batch2, num_classes2 = 40, 24
    x2 = jax.random.normal(kx2, (batch2, num_classes2), dtype=jnp.bfloat16)
    t2 = jax.random.randint(kt2, (batch2,), 0, num_classes2, dtype=jnp.int32)
    loss2 = jax.block_until_ready(
        cross_entropy_label_smooth(x2, t2, epsilon=0.1, block_rows=16)
    )
    ref2 = _reference(x2, t2, epsilon=0.1)
    assert jnp.allclose(loss2, ref2, atol=1e-2, rtol=1e-2), (loss2, ref2)

    print("KERNEL_OK")
</pallas_src>

<mosaic_0001>
module attributes {stable_mosaic.version = 11 : i64} {
  func.func @_ce_label_smooth_kernel(%arg0: i32, %arg1: i32, %arg2: memref<8x16xf32, #tpu.memory_space<vmem>>, %arg3: memref<8x1xi32, #tpu.memory_space<vmem>>, %arg4: memref<8x128xf32, #tpu.memory_space<vmem>>, %arg5: memref<8x1xf32, #tpu.memory_space<vmem>>) attributes {dimension_semantics = [#tpu.dimension_semantics<parallel>, #tpu.dimension_semantics<arbitrary>], iteration_bounds = array<i64: 1, 1>, scalar_prefetch = 0 : i64, scratch_operands = 1 : i64, tpu.core_type = #tpu.core_type<tc>, window_params = [{transform_indices = @transform_0, window_bounds = array<i64: 8, 16>}, {transform_indices = @transform_1, window_bounds = array<i64: 8, 1>}, {transform_indices = @transform_2, window_bounds = array<i64: 8, 128>}]} {
    %c0_i32 = arith.constant 0 : i32
    %0 = arith.cmpi eq, %arg1, %c0_i32 : i32
    %1 = arith.extui %0 : i1 to i32
    %c0_i32_0 = arith.constant 0 : i32
    %2 = arith.cmpi ne, %1, %c0_i32_0 : i32
    scf.if %2 {
      %cst_18 = arith.constant 0.000000e+00 : f32
      %42 = vector.broadcast %cst_18 : f32 to vector<8x1xf32>
      %c0_19 = arith.constant 0 : index
      %c0_20 = arith.constant 0 : index
      %43 = vector.load %arg5[%c0_19, %c0_20] : memref<8x1xf32, #tpu.memory_space<vmem>>, vector<8x1xf32>
      tpu.vector_store %arg5[%c0_19, %c0_20], %42 {strides = array<i32>} : memref<8x1xf32, #tpu.memory_space<vmem>>, vector<8x1xf32>,
    } else {
    }
    %c0 = arith.constant 0 : index
    %c0_1 = arith.constant 0 : index
    %3 = vector.load %arg2[%c0, %c0_1] : memref<8x16xf32, #tpu.memory_space<vmem>>, vector<8x16xf32>
    %c1_i32 = arith.constant 1 : i32
    %4 = arith.muli %arg0, %c1_i32 : i32
    %5 = arith.addi %4, %arg1 : i32
    %c8_i32 = arith.constant 8 : i32
    %6 = arith.muli %5, %c8_i32 : i32
    %7 = tpu.iota {dimensions = array<i32: 0>} : vector<8x1xi32>
    %8 = vector.broadcast %6 : i32 to vector<8x1xi32>
    %9 = arith.addi %8, %7 : vector<8x1xi32>
    %c8_i32_2 = arith.constant 8 : i32
    %10 = vector.broadcast %c8_i32_2 : i32 to vector<8x1xi32>
    %11 = arith.cmpi slt, %9, %10 : vector<8x1xi32>
    %cst = arith.constant dense<0xFF800000> : vector<8xf32>
    %12 = vector.multi_reduction <maximumf>, %3, %cst [1] : vector<8x16xf32> to vector<8xf32>
    %13 = vector.shape_cast %12 : vector<8xf32> to vector<8x1xf32>
    %14 = vector.broadcast %13 : vector<8x1xf32> to vector<8x16xf32>
    %15 = arith.subf %3, %14 : vector<8x16xf32>
    %16 = math.exp %15 : vector<8x16xf32>
    %cst_3 = arith.constant 1.000000e+00 : f32
    %17 = vector.broadcast %cst_3 : f32 to vector<16x128xf32>
    %cst_4 = arith.constant dense<0.000000e+00> : vector<8x128xf32>
    %18 = tpu.matmul %16, %17, %cst_4 {dimension_numbers = #tpu.dot_dimension_numbers<[1], [0], [0], [1], [0, 0, 1, 1], [], []>} : vector<8x16xf32>, vector<16x128xf32>, vector<8x128xf32> -> vector<8x128xf32>
    %19 = vector.extract_strided_slice %18 {offsets = [0, 0], sizes = [8, 1], strides = [1, 1]} : vector<8x128xf32> to vector<8x1xf32>
    %20 = math.log %19 : vector<8x1xf32>
    %21 = arith.addf %13, %20 : vector<8x1xf32>
    %22 = tpu.iota {dimensions = array<i32: 1>} : vector<8x16xi32>
    %c0_5 = arith.constant 0 : index
    %c0_6 = arith.constant 0 : index
    %23 = vector.load %arg3[%c0_5, %c0_6] : memref<8x1xi32, #tpu.memory_space<vmem>>, vector<8x1xi32>
    %24 = vector.broadcast %23 : vector<8x1xi32> to vector<8x16xi32>
    %25 = arith.cmpi eq, %22, %24 : vector<8x16xi32>
    %cst_7 = arith.constant 9.062500e-01 : f32
    %cst_8 = arith.constant 6.250000e-03 : f32
    %26 = vector.broadcast %cst_7 : f32 to vector<8x16xf32>
    %27 = vector.broadcast %cst_8 : f32 to vector<8x16xf32>
    %28 = arith.select %25, %26, %27 : vector<8x16xi1>, vector<8x16xf32>
    %cst_9 = arith.constant 1.000000e+00 : f32
    %29 = vector.broadcast %cst_9 : f32 to vector<16x128xf32>
    %30 = arith.mulf %28, %3 : vector<8x16xf32>
    %cst_10 = arith.constant dense<0.000000e+00> : vector<8x128xf32>
    %31 = tpu.matmul %30, %29, %cst_10 {dimension_numbers = #tpu.dot_dimension_numbers<[1], [0], [0], [1], [0, 0, 1, 1], [], []>} : vector<8x16xf32>, vector<16x128xf32>, vector<8x128xf32> -> vector<8x128xf32>
    %32 = vector.extract_strided_slice %31 {offsets = [0, 0], sizes = [8, 1], strides = [1, 1]} : vector<8x128xf32> to vector<8x1xf32>
    %33 = arith.subf %21, %32 : vector<8x1xf32>
    %c0_11 = arith.constant 0 : index
    %c0_12 = arith.constant 0 : index
    %34 = vector.load %arg5[%c0_11, %c0_12] : memref<8x1xf32, #tpu.memory_space<vmem>>, vector<8x1xf32>
    %cst_13 = arith.constant 0.000000e+00 : f32
    %35 = vector.broadcast %cst_13 : f32 to vector<8x1xf32>
    %36 = arith.select %11, %33, %35 : vector<8x1xi1>, vector<8x1xf32>
    %37 = arith.addf %34, %36 : vector<8x1xf32>
    %c0_14 = arith.constant 0 : index
    %c0_15 = arith.constant 0 : index
    %38 = vector.load %arg5[%c0_14, %c0_15] : memref<8x1xf32, #tpu.memory_space<vmem>>, vector<8x1xf32>
    tpu.vector_store %arg5[%c0_14, %c0_15], %37 {strides = array<i32>} : memref<8x1xf32, #tpu.memory_space<vmem>>, vector<8x1xf32>,
    %c0_i32_16 = arith.constant 0 : i32
    %39 = arith.cmpi eq, %arg1, %c0_i32_16 : i32
    %40 = arith.extui %39 : i1 to i32
    %c0_i32_17 = arith.constant 0 : i32
    %41 = arith.cmpi ne, %40, %c0_i32_17 : i32
    scf.if %41 {
      %c0_18 = arith.constant 0 : index
      %c0_19 = arith.constant 0 : index
      %42 = vector.load %arg5[%c0_18, %c0_19] : memref<8x1xf32, #tpu.memory_space<vmem>>, vector<8x1xf32>
      %43 = vector.shape_cast %42 : vector<8x1xf32> to vector<1x8x1xf32>
      %cst_20 = arith.constant dense<0.000000e+00> : vector<1xf32>
      %44 = vector.multi_reduction <add>, %43, %cst_20 [1, 2] : vector<1x8x1xf32> to vector<1xf32>
      %45 = vector.shape_cast %44 : vector<1xf32> to vector<1x1x1xf32>
      %46 = vector.extract %45[0, 0, 0] : f32 from vector<1x1x1xf32>
      %47 = vector.broadcast %46 : f32 to vector<1x1xf32>
      %48 = vector.shape_cast %47 : vector<1x1xf32> to vector<1x1xf32>
      %49 = vector.broadcast %48 : vector<1x1xf32> to vector<8x128xf32>
      %c0_21 = arith.constant 0 : index
      %c0_22 = arith.constant 0 : index
      %50 = vector.load %arg4[%c0_21, %c0_22] : memref<8x128xf32, #tpu.memory_space<vmem>>, vector<8x128xf32>
      tpu.vector_store %arg4[%c0_21, %c0_22], %49 {strides = array<i32>} : memref<8x128xf32, #tpu.memory_space<vmem>>, vector<8x128xf32>,
    } else {
    }
    return
  }
  func.func @transform_0(%arg0: i32, %arg1: i32) -> (i32, i32) {
    %c1_i32 = arith.constant 1 : i32
    %0 = arith.muli %arg0, %c1_i32 : i32
    %1 = arith.addi %0, %arg1 : i32
    %c0_i32 = arith.constant 0 : i32
    %2 = arith.minsi %1, %c0_i32 : i32
    %c0_i32_0 = arith.constant 0 : i32
    %c0_i32_1 = arith.constant 0 : i32
    return %2, %c0_i32_0 : i32, i32
  }
  func.func @transform_1(%arg0: i32, %arg1: i32) -> (i32, i32) {
    %c1_i32 = arith.constant 1 : i32
    %0 = arith.muli %arg0, %c1_i32 : i32
    %1 = arith.addi %0, %arg1 : i32
    %c0_i32 = arith.constant 0 : i32
    %2 = arith.minsi %1, %c0_i32 : i32
    %c0_i32_0 = arith.constant 0 : i32
    %c0_i32_1 = arith.constant 0 : i32
    return %2, %c0_i32_0 : i32, i32
  }
  func.func @transform_2(%arg0: i32, %arg1: i32) -> (i32, i32) {
    %c0_i32 = arith.constant 0 : i32
    %c0_i32_0 = arith.constant 0 : i32
    return %arg0, %c0_i32 : i32, i32
  }
}

</mosaic_0001>

<bundles_post_ra>
// kernel: tpu_custom_call.1
= control target key start
LH: loop header
LB: loop body
LE: loop exit
PB: predicated region body
PF: predicated region fallthrough
CT: control target
= control target key end

     0   :  { %vm80_vm0 = vcmask 130048   ;;  %s383_s0 = inlined_call_operand.vmem [shape: f32[8,16], index: 0, kind: input, shape index: {}]   ;;  %s384_s1 = inlined_call_operand.vmem [shape: s32[8,1], index: 1, kind: input, shape index: {}]   ;;  %s385_s2 = inlined_call_operand.hbm [shape: f32[8,128], index: 2, kind: output, shape index: {}]  }
   0x1   :  { %v72_v0 = vld [vmem:[%s383_s0] sm:$0xff] }
   0x2   :  { %7 = vsyncpa [#allocation4], 0  ;;  %v81_v1 = vsel %vm80_vm0, %v72_v0, -inf  ;;  %v350_v2 = vmov 0   ;;  %v351_v3 = vmov 0.0   ;;  %vm352_vm1 = vmmov 0  }
   0x3   :  { %323 = vset.pattern.permute.xlu0 %v350_v2  ;;  %301 = vmatprep.subr.mxu0 %v351_v3  ;;  %v353_v4 = vmov 1.0   ;;  %v165_v5 = vld [vmem:[%s384_s1] sm:$0xff]  ;;  %v163_v8 = vlaneseq  ;;  %v354_v12 = vmov 0.00625   ;;  %vm70_vm3 = vcmask 7168   ;;  %s355_s1 = smov [#allocation3]  }
   0x4   :  { %82 = vmax.xlane.f32.xlu0 %v81_v1  ;;  %305 = vmatprep.mubr.msk.f32.mxu0 %vm352_vm1, %v351_v3  ;;  %71 = vst.msk [vmem:[#allocation2] sm:$0xff] %vm70_vm3, %v351_v3  ;;  %s273_s12 = sshll.u32 %s355_s1, 4  ;;  %s274_s12 = int_to_ptr.vmem [resolvable:$true] %s273_s12 }
   0x5   :  { %302 = vmatpush3.msra.mxu0 %v353_v4  ;;  %308 = vmatprep.subr.mxu1 %v351_v3  ;;  %v164_v10 = vand.u32 127, %v163_v8  ;;  %s328_s14 = scalar_lea.vmem %s274_s12, 128  ;;  %p333_p1 = scmp.lt.s32.totalorder %s274_s12, %s274_s12 }
   0x6   :  { %303 = vmatprep.subr.mxu0 %v351_v3  ;;  %309 = vmatpush3.msra.mxu1 %v353_v4  ;;  %p329_p0 = scmp.ne.s32.totalorder %s274_s12, %s328_s14  ;;  %p334_p2 = scmp.lt.s32.totalorder %s328_s14, %s328_s14 }
   0x7   :  { %304 = vmatpush3.msra.mxu0 %v353_v4  ;;  %310 = vmatprep.subr.mxu1 %v351_v3 }
   0x8   :  { %311 = vmatpush3.msra.mxu1 %v353_v4  ;;  %312 = vmatprep.mubr.msk.f32.mxu1 %vm352_vm1, %v351_v3  ;;  %p335_p3 = por %p334_p2, %p333_p1 }
   0xa   :  { %p336_p4 = pnand %p335_p3, %p329_p0 }
   0xb   :  { %v246_v23 = vld [vmem:[#allocation2] sm:$0xff] }
  0x1a   :  { %167 = vperm.xlu0 %323, %v165_v5  }
  0x8d   :  { %v83_v6 = vpop.xlane.xlu0 %82 }
  0x8e   :  { %v84_v7 = vsub.f32 %v72_v0, %v83_v6 }
  0x90   :  { %v85_v9 = vmul.f32 1.442695, %v84_v7 }
  0x92   :  { %324 = vpow2.f32 %v85_v9 }
  0x95   :  { %v168_v11 = vpop.permute.xlu0 %167 }
  0x96   :  { %vm169_vm2 = vcmp.eq.s32.totalorder %v164_v10, %v168_v11 }
  0x97   :  { %v170_v13 = vsel %vm169_vm2, 0.90625, %v354_v12 }
  0x98   :  { %v171_v14 = vmul.f32 %v170_v13, %v72_v0 }
  0x9a   :  { %313 = vmatmul.mubr.msk.f32.vlgmr.msra.gmra.mxu1 %vm80_vm0, %v171_v14 }
  0x9f   :  { %v325_v15 = vpop.eup %324 }
  0xa0   :  { %306 = vmatmul.mubr.msk.f32.vlgmr.msra.gmra.mxu0 %vm80_vm0, %v325_v15 }
 0x15a   :  { %v241_v16 = vpop.f32.mrf.mxu1 }
 0x15c   :  { %v314_v17 = vpop.f32.mrf.mxu1 }
 0x160   :  { %v156_v18 = vpop.f32.mrf.mxu0 }
 0x161   :  { %326 = vlog2.f32 %v156_v18 }
 0x162   :  { %v307_v19 = vpop.f32.mrf.mxu0 }
 0x16e   :  { %v327_v20 = vpop.eup %326 }
 0x16f   :  { %v161_v21 = vmul.f32 0.6931472, %v327_v20 }
 0x171   :  { %v162_v22 = vadd.f32 %v161_v21, %v83_v6 }
 0x173   :  { %v245_v24 = vsub.f32 %v162_v22, %v241_v16 }
 0x175   :  { %v248_v25 = vadd.f32 %v246_v23, %v245_v24 }
 0x177   :  { %250 = vst.msk [vmem:[#allocation2] sm:$0xff] %vm70_vm3, %v248_v25 }
 0x17e   :  { %v254_v26 = vld [vmem:[#allocation2] sm:$0xff] }
 0x17f   :  { %v255_v27 = vsel %vm70_vm3, %v254_v26, 0.0 }
 0x180   :  { %256 = vadd.xlane.f32.xlu1 %v255_v27 }
 0x209   :  { %v257_v28 = vpop.xlane.xlu1 %256 }
 0x20a   :  { %v258_v29 = vrot.slane %v257_v28, 4 }
 0x20c   :  { %v259_v30 = vadd.f32 %v258_v29, %v257_v28 }
 0x20e   :  { %v260_v31 = vrot.slane %v259_v30, 2 }
 0x210   :  { %v261_v32 = vadd.f32 %v260_v31, %v259_v30 }
 0x212   :  { %v262_v33 = vrot.slane %v261_v32, 1 }
 0x214   :  { %v263_v34 = vadd.f32 %v262_v33, %v261_v32 }
 0x216   :  { %315 = vpush %v263_v34 }
 0x247   :  { %s316_s13 = spop %315 }
 0x248   :  { %v265_v35 = vstv %s316_s13 }
 0x249   :  { %266 = vst [vmem:[#allocation3] sm:$0xff] %v265_v35 }
 0x24a   :  { %339 = shalt.err (!%p336_p4)
}
 0x24b   :  { %276 = dma.vmem_to_hbm [thread:$0]  %s274_s12, 128, %s385_s2, [#allocation4]  }
 0x24c   :  { %348 = dma.done.wait [#allocation4], 128  }
 0x24d   :  { %349 = vsyncadd [#allocation4], 4294967168 }
 0x24e   :  { %280 = vsyncpa [#allocation4], 1 }

</bundles_post_ra>
